<compile_context>
chip_gen: v6e
topology: v6e:2x2x1
jax: 0.10.0
libtpu: 0.0.40
codegen_flags: <defaults>
</compile_context>

<pallas_src>
from functools import partial

import jax
import jax.numpy as jnp
from jax.experimental import pallas as pl
from jax.experimental.pallas import tpu as pltpu


_LANE = 128
_MAX_LANE_TILE = 2048                 # per-block lane width cap
_VMEM_BUDGET = 20 * 1024 * 1024       # target for double-buffered blocks (+A)
_VMEM_LIMIT = 32 * 1024 * 1024        # scoped VMEM limit requested (ok v5e/v6e/v7x)
_SMALL_PROBLEM_ELEMS = 16 * 1024      # below this, fused XLA beats a kernel launch
_NATIVE_LAYOUT_MIN_C = 64             # C >= this -> native (B,T,C) layout, no transposes


def _moving_avg_kernel(a_ref, x_ref, o_ref, *, inv_k):
    # a_ref: (T_out, T) banded count matrix (edge replication + stride folded in).
    # x_ref: (T, lane_tile) input block, time on sublanes, channels/lanes last.
    # o_ref: (T_out, lane_tile) output block.
    a = a_ref[...]
    x = x_ref[...]
    if x.dtype != a.dtype:            # static (trace-time) branch; rare dtypes only
        x = x.astype(jnp.float32)
    acc = jnp.dot(a, x, preferred_element_type=jnp.float32)   # MXU, f32 accumulate
    o_ref[...] = (acc * jnp.float32(inv_k)).astype(o_ref.dtype)


def _build_band_matrix(t_in, kernel_size, stride, dtype):
    """Banded count matrix A s.t. (A @ x) / K == moving average with edge padding."""
    pad = (kernel_size - 1) // 2
    t_out = (t_in + 2 * pad - kernel_size) // stride + 1
    if t_out < 1:
        raise ValueError("kernel_size too large for the input length")
    starts = jnp.arange(t_out, dtype=jnp.int32) * stride
    offs = jnp.arange(kernel_size, dtype=jnp.int32)
    # Padded index t*stride + w maps to clip(t*stride + w - pad, 0, t_in-1) under
    # edge replication; duplicates at the edges accumulate into counts > 1.
    src = jnp.clip(starts[:, None] + offs[None, :] - pad, 0, t_in - 1)
    rows = jnp.broadcast_to(jnp.arange(t_out, dtype=jnp.int32)[:, None], src.shape)
    a = jnp.zeros((t_out, t_in), jnp.float32).at[rows, src].add(1.0)
    return a.astype(dtype), t_out      # small-integer counts: exact in bf16 too


def _pick_lane_tile(n_lanes, t_in, t_out, x_bytes, a_bytes, *, min_grid=1,
                    max_tile=_MAX_LANE_TILE, budget=_VMEM_BUDGET):
    """Pick (lane_tile, padded_lane_count). lane_tile divides the padded count."""
    a_cost = 2 * t_out * t_in * a_bytes          # A, conservatively double-buffered
    per_lane = 2 * (t_in + t_out) * x_bytes      # x block + out block, double-buffered
    fit = max(_LANE, int((budget - a_cost) // max(per_lane, 1)))
    cap = max(_LANE, min(max_tile, (fit // _LANE) * _LANE))
    # Full-extent block: no padding copy, no (8,128) constraint.  Used unless we
    # need >= 2 grid steps (v7x megacore) and the lane count is big enough to split.
    if n_lanes <= cap and (min_grid <= 1 or n_lanes < 2 * _LANE):
        return n_lanes, n_lanes
    n128 = pl.cdiv(n_lanes, _LANE) * _LANE
    tile = min(cap, n128)
    if min_grid > 1:
        tile = min(tile, pl.cdiv(n128 // _LANE, min_grid) * _LANE)
    tile = max(tile, _LANE)
    n_padded = pl.cdiv(n128, tile) * tile
    return tile, n_padded


def _xla_moving_avg(x, kernel_size, stride):
    """Small-problem fallback: fused XLA cumulative-sum formulation."""
    pad = (kernel_size - 1) // 2
    xp = jnp.concatenate(
        [jnp.repeat(x[:, :1], pad, axis=1), x, jnp.repeat(x[:, -1:], pad, axis=1)],
        axis=1,
    ).astype(jnp.float32)
    t_out = (xp.shape[1] - kernel_size) // stride + 1
    cs = jnp.cumsum(xp, axis=1)
    cs = jnp.concatenate([jnp.zeros_like(cs[:, :1]), cs], axis=1)
    idx = jnp.arange(t_out) * stride
    sums = cs[:, idx + kernel_size] - cs[:, idx]
    return (sums / kernel_size).astype(x.dtype)


def moving_avg(x, kernel_size, stride, *, use_pallas=None):
    """Pallas implementation of MovingAvg.forward. x: (B, T, C) -> (B, T_out, C)."""
    B, T, C = x.shape
    if use_pallas is None:
        use_pallas = (B * T * C) >= _SMALL_PROBLEM_ELEMS
    if not use_pallas:
        return _xla_moving_avg(x, kernel_size, stride)

    # bf16 fast path: keep the dot bf16 x bf16 on the MXU (f32 accumulation).
    a_dtype = jnp.bfloat16 if x.dtype == jnp.bfloat16 else jnp.float32
    a, T_out = _build_band_matrix(T, kernel_size, stride, a_dtype)
    a_bytes = 2 if a_dtype == jnp.bfloat16 else 4
    x_bytes = x.dtype.itemsize
    kernel = partial(_moving_avg_kernel, inv_k=1.0 / kernel_size)
    compiler_params = lambda naxes: pltpu.CompilerParams(
        dimension_semantics=("parallel",) * naxes,
        vmem_limit_bytes=_VMEM_LIMIT,
    )

    if C >= _NATIVE_LAYOUT_MIN_C:
        # Native (B, T, C) layout: no transposes, grid over (batch, channel tiles).
        min_grid_c = 1 if B >= 2 else 2          # >=2 total grid steps for v7x megacore
        c_tile, C_pad = _pick_lane_tile(C, T, T_out, x_bytes, a_bytes,
                                        min_grid=min_grid_c)
        xin = x if C_pad == C else jnp.pad(x, ((0, 0), (0, 0), (0, C_pad - C)))
        out = pl.pallas_call(
            kernel,
            out_shape=jax.ShapeDtypeStruct((B, T_out, C_pad), x.dtype),
            grid_spec=pltpu.PrefetchScalarGridSpec(
                num_scalar_prefetch=0,
                grid=(B, C_pad // c_tile),
                in_specs=[
                    # A: same block every step -> stays VMEM-resident.
                    pl.BlockSpec((T_out, T), lambda b, c: (0, 0)),
                    pl.BlockSpec((pl.Squeezed(), T, c_tile), lambda b, c: (b, 0, c)),
                ],
                out_specs=pl.BlockSpec((pl.Squeezed(), T_out, c_tile),
                                       lambda b, c: (b, 0, c)),
            ),
            compiler_params=compiler_params(2),
        )(a, xin)
        return out if C_pad == C else out[:, :, :C]

    # Small-C path: flatten to a lane-dense (T, B*C) slab (transpose round-trip is
    # cheaper than padding a tiny C up to 128 lanes).
    L = B * C
    min_grid_l = 2 if L >= 2 * _LANE else 1
    lane_tile, L_pad = _pick_lane_tile(L, T, T_out, x_bytes, a_bytes,
                                       min_grid=min_grid_l)
    x2 = jnp.transpose(x, (1, 0, 2)).reshape(T, L)
    if L_pad != L:
        x2 = jnp.pad(x2, ((0, 0), (0, L_pad - L)))
    out2 = pl.pallas_call(
        kernel,
        out_shape=jax.ShapeDtypeStruct((T_out, L_pad), x.dtype),
        grid_spec=pltpu.PrefetchScalarGridSpec(
            num_scalar_prefetch=0,
            grid=(L_pad // lane_tile,),
            in_specs=[
                pl.BlockSpec((T_out, T), lambda l: (0, 0)),       # A (shared)
                pl.BlockSpec((T, lane_tile), lambda l: (0, l)),   # x slab
            ],
            out_specs=pl.BlockSpec((T_out, lane_tile), lambda l: (0, l)),
        ),
        compiler_params=compiler_params(1),
    )(a, x2)
    out = out2[:, :L].reshape(T_out, B, C)
    return jnp.transpose(out, (1, 0, 2))


def _reference_moving_avg(x, kernel_size, stride):
    pad = (kernel_size - 1) // 2
    front = jnp.repeat(x[:, 0:1, :], pad, axis=1)
    end = jnp.repeat(x[:, -1:, :], pad, axis=1)
    xp = jnp.concatenate([front, x, end], axis=1)
    t_out = (xp.shape[1] - kernel_size) // stride + 1
    windows = jnp.stack(
        [xp[:, t * stride: t * stride + kernel_size, :] for t in range(t_out)],
        axis=1,
    )  # (B, T_out, K, C)
    return windows.mean(axis=2)


if __name__ == "__main__":
    key = jax.random.PRNGKey(0)
    k1, k2, k3 = jax.random.split(key, 3)

    # 1) Small config (flattened lane-dense Pallas path), f32.
    B, T, C = 2, 16, 8
    ks, st = 5, 1
    x = jax.random.normal(k1, (B, T, C), dtype=jnp.float32)
    y = jax.block_until_ready(moving_avg(x, ks, st, use_pallas=True))
    y_ref = _reference_moving_avg(x, ks, st)
    assert y.shape == y_ref.shape, (y.shape, y_ref.shape)
    assert jnp.allclose(y, y_ref, atol=1e-5, rtol=1e-5)

    # 2) Native-layout Pallas path (no transposes), even kernel, stride 2, f32.
    B2, T2, C2 = 2, 24, 160
    ks2, st2 = 4, 2
    x2 = jax.random.normal(k2, (B2, T2, C2), dtype=jnp.float32)
    y2 = jax.block_until_ready(moving_avg(x2, ks2, st2, use_pallas=True))
    y2_ref = _reference_moving_avg(x2, ks2, st2)
    assert y2.shape == y2_ref.shape, (y2.shape, y2_ref.shape)
    assert jnp.allclose(y2, y2_ref, atol=1e-5, rtol=1e-5)

    # 3) bf16 fast path (bf16 x bf16 MXU dot, f32 accumulation, 1/K on VPU).
    B3, T3, C3 = 2, 32, 128
    ks3, st3 = 7, 1
    x3 = jax.random.normal(k3, (B3, T3, C3), dtype=jnp.float32).astype(jnp.bfloat16)
    y3 = jax.block_until_ready(moving_avg(x3, ks3, st3, use_pallas=True))
    y3_ref = _reference_moving_avg(x3.astype(jnp.float32), ks3, st3)
    assert y3.shape == y3_ref.shape, (y3.shape, y3_ref.shape)
    assert jnp.allclose(y3.astype(jnp.float32), y3_ref, atol=2e-2, rtol=2e-2)

    # 4) Small-problem auto-fallback (pure XLA) stays consistent with the kernel.
    y4 = jax.block_until_ready(moving_avg(x, ks, st))
    assert jnp.allclose(y4, y_ref, atol=1e-5, rtol=1e-5)

    print("KERNEL_OK")
</pallas_src>

<mosaic_0001>
module attributes {stable_mosaic.version = 11 : i64} {
  func.func @_moving_avg_kernel(%arg0: i32, %arg1: memref<16x16xf32, #tpu.memory_space<vmem>>, %arg2: memref<16x16xf32, #tpu.memory_space<vmem>>, %arg3: memref<16x16xf32, #tpu.memory_space<vmem>>) attributes {dimension_semantics = [#tpu.dimension_semantics<parallel>], iteration_bounds = array<i64: 1>, scalar_prefetch = 0 : i64, scratch_operands = 0 : i64, tpu.core_type = #tpu.core_type<tc>, window_params = [{pipeline_mode = #tpu.pipeline_mode<synchronous>, transform_indices = @transform_0, window_bounds = array<i64: 16, 16>}, {transform_indices = @transform_1, window_bounds = array<i64: 16, 16>}, {transform_indices = @transform_2, window_bounds = array<i64: 16, 16>}]} {
    %c0 = arith.constant 0 : index
    %c0_0 = arith.constant 0 : index
    %0 = vector.load %arg1[%c0, %c0_0] : memref<16x16xf32, #tpu.memory_space<vmem>>, vector<16x16xf32>
    %c0_1 = arith.constant 0 : index
    %c0_2 = arith.constant 0 : index
    %1 = vector.load %arg2[%c0_1, %c0_2] : memref<16x16xf32, #tpu.memory_space<vmem>>, vector<16x16xf32>
    %cst = arith.constant dense<0.000000e+00> : vector<16x16xf32>
    %2 = tpu.matmul %0, %1, %cst {dimension_numbers = #tpu.dot_dimension_numbers<[1], [0], [0], [1], [0, 0, 1, 1], [], []>} : vector<16x16xf32>, vector<16x16xf32>, vector<16x16xf32> -> vector<16x16xf32>
    %cst_3 = arith.constant 2.000000e-01 : f32
    %3 = vector.broadcast %cst_3 : f32 to vector<16x16xf32>
    %4 = arith.mulf %2, %3 : vector<16x16xf32>
    %c0_4 = arith.constant 0 : index
    %c0_5 = arith.constant 0 : index
    %5 = vector.load %arg3[%c0_4, %c0_5] : memref<16x16xf32, #tpu.memory_space<vmem>>, vector<16x16xf32>
    tpu.vector_store %arg3[%c0_4, %c0_5], %4 {strides = array<i32>} : memref<16x16xf32, #tpu.memory_space<vmem>>, vector<16x16xf32>,
    return
  }
  func.func @transform_0(%arg0: i32) -> (i32, i32) {
    %c0_i32 = arith.constant 0 : i32
    %c0_i32_0 = arith.constant 0 : i32
    %c0_i32_1 = arith.constant 0 : i32
    return %c0_i32, %c0_i32_0 : i32, i32
  }
  func.func @transform_1(%arg0: i32) -> (i32, i32) {
    %c0_i32 = arith.constant 0 : i32
    %c0_i32_0 = arith.constant 0 : i32
    return %c0_i32, %arg0 : i32, i32
  }
  func.func @transform_2(%arg0: i32) -> (i32, i32) {
    %c0_i32 = arith.constant 0 : i32
    %c0_i32_0 = arith.constant 0 : i32
    return %c0_i32, %arg0 : i32, i32
  }
}

</mosaic_0001>

<bundles_post_ra>
// kernel: tpu_custom_call.1
= control target key start
LH: loop header
LB: loop body
LE: loop exit
PB: predicated region body
PF: predicated region fallthrough
CT: control target
= control target key end

     0   :  { %7 = vsyncpa [#allocation3], 0  ;;  %s274_s0 = inlined_call_operand.hbm [shape: f32[16,16], index: 0, kind: input, shape index: {}]   ;;  %s275_s1 = inlined_call_operand.hbm [shape: f32[16,16], index: 1, kind: input, shape index: {}]   ;;  %s276_s2 = inlined_call_operand.hbm [shape: f32[16,16], index: 2, kind: output, shape index: {}]  }
   0x1   :  { %8 = vsyncpa [#allocation6], 0 }
   0x2   :  { %9 = vsyncpa [#allocation4], 0  ;;  %s232_s9 = smov [#allocation2]  }
   0x3   :  { %s15_s10 = sshll.u32 %s232_s9, 4  ;;  %s16_s10 = int_to_ptr.vmem [resolvable:$true] %s15_s10 }
   0x4   :  { %s174_s11 = scalar_lea.vmem %s16_s10, 256  ;;  %p179_p1 = scmp.lt.s32.totalorder %s16_s10, %s16_s10 }
   0x5   :  { %p175_p0 = scmp.ne.s32.totalorder %s16_s10, %s174_s11  ;;  %p180_p2 = scmp.lt.s32.totalorder %s174_s11, %s174_s11 }
   0x7   :  { %p181_p3 = por %p180_p2, %p179_p1 }
   0x9   :  { %p182_p4 = pnand %p181_p3, %p175_p0 }
   0xb   :  { %185 = shalt.err (!%p182_p4)
}
   0xc   :  { %s233_s12 = smov 128   ;;  %s234_s13 = smov 8  }
   0xd   :  { %21 = dma.hbm_to_vmem [thread:$0]  %s274_s0, 256, %s16_s10, [#allocation3], %s233_s12, %s233_s12, %s234_s13  }
   0xe   :  { %s235_s16 = smov [#allocation5]  }
   0xf   :  { %s27_s17 = sshll.u32 %s235_s16, 4  ;;  %s28_s17 = int_to_ptr.vmem [resolvable:$true] %s27_s17 }
  0x10   :  { %s194_s18 = scalar_lea.vmem %s28_s17, 256  ;;  %p199_p6 = scmp.lt.s32.totalorder %s28_s17, %s28_s17 }
  0x11   :  { %p195_p5 = scmp.ne.s32.totalorder %s28_s17, %s194_s18  ;;  %p200_p7 = scmp.lt.s32.totalorder %s194_s18, %s194_s18 }
  0x13   :  { %p201_p8 = por %p200_p7, %p199_p6 }
  0x15   :  { %p202_p9 = pnand %p201_p8, %p195_p5 }
  0x17   :  { %205 = shalt.err (!%p202_p9)
}
  0x18   :  { %33 = dma.hbm_to_vmem [thread:$0]  %s275_s1, 256, %s28_s17, [#allocation6], %s233_s12, %s233_s12, %s234_s13  }
  0x19   :  { %226 = dma.done.wait [#allocation3], 256  }
  0x1a   :  { %227 = vsyncadd [#allocation3], 4294967040 }
  0x1b   :  { %228 = dma.done.wait [#allocation6], 256  }
  0x1c   :  { %229 = vsyncadd [#allocation6], 4294967040  ;;  %vm44_vm0 = vcmask 130048   ;;  %v43_v0 = vld [vmem:[#allocation5 + $0x8] sm:$0xff]  ;;  %v42_v1 = vld [vmem:[#allocation5] sm:$0xff]  ;;  %s236_s0 = smov [#allocation7]  }
  0x1d   :  { %v40_v2 = vld [vmem:[#allocation2] sm:$0xff]  ;;  %154 = vmatprep.subr.mxu0 %v43_v0  ;;  %v41_v3 = vld [vmem:[#allocation2 + $0x8] sm:$0xff]  ;;  %s135_s1 = sshll.u32 %s236_s0, 4  ;;  %s136_s1 = int_to_ptr.vmem [resolvable:$true] %s135_s1 }
  0x1e   :  { %158 = vmatprep.mubr.msk.f32.mxu0 %vm44_vm0, %v40_v2  ;;  %155 = vmatpush3.msra.mxu0 %v43_v0  ;;  %s206_s21 = scalar_lea.vmem %s136_s1, 256  ;;  %p211_p11 = scmp.lt.s32.totalorder %s136_s1, %s136_s1 }
  0x1f   :  { %156 = vmatprep.subr.mxu0 %v42_v1  ;;  %p207_p10 = scmp.ne.s32.totalorder %s136_s1, %s206_s21  ;;  %p212_p12 = scmp.lt.s32.totalorder %s206_s21, %s206_s21 }
  0x20   :  { %157 = vmatpush3.msra.mxu0 %v42_v1 }
  0x21   :  { %159 = vmatmul.mubr.msk.f32.vlgmr.msra.gmra.mxu0 %vm44_vm0, %v41_v3  ;;  %p213_p13 = por %p212_p12, %p211_p11 }
  0x23   :  { %p214_p0 = pnand %p213_p13, %p207_p10 }
  0xe1   :  { %v160_v4 = vpop.f32.mrf.mxu0 }
  0xe2   :  { %v127_v5 = vmul.f32 0.2, %v160_v4 }
  0xe3   :  { %v117_v6 = vpop.f32.mrf.mxu0 }
  0xe4   :  { %129 = vst.msk [vmem:[#allocation7 + $0x8] sm:$0xff] %vm44_vm0, %v127_v5  ;;  %v126_v7 = vmul.f32 0.2, %v117_v6 }
  0xe6   :  { %128 = vst.msk [vmem:[#allocation7] sm:$0xff] %vm44_vm0, %v126_v7 }
  0xe7   :  { %217 = shalt.err (!%p214_p0)
}
  0xe8   :  { %141 = dma.vmem_to_hbm [thread:$0]  %s136_s1, 256, %s276_s2, [#allocation4], %s233_s12, %s233_s12, %s234_s13  }
  0xe9   :  { %230 = dma.done.wait [#allocation4], 256  }
  0xea   :  { %231 = vsyncadd [#allocation4], 4294967040 }
  0xeb   :  { %145 = vsyncpa [#allocation3], 1 }
  0xec   :  { %146 = vsyncpa [#allocation6], 1 }
  0xed   :  { %147 = vsyncpa [#allocation4], 1 }

</bundles_post_ra>
